<compile_context>
chip_gen: v6e
topology: v6e:2x2x1
jax: 0.10.0
libtpu: 0.0.40
codegen_flags: <defaults>
</compile_context>

<pallas_src>
import functools

import jax
import jax.numpy as jnp
from jax.experimental import pallas as pl
from jax.experimental.pallas import tpu as pltpu

_LANES = 128
_MIB = 1024 * 1024
_MIN_PARALLEL_BLOCKS = 2      # >= 2 grid steps so megacore (v7x: 2 TCs) has work


def _vmem_config():
    """Return (per-pipeline-buffer byte budget, vmem_limit_bytes) for this TPU."""
    try:
        info = pltpu.get_tpu_info()
        cap = int(getattr(info, "vmem_capacity_bytes", 64 * _MIB))
    except Exception:
        cap = 64 * _MIB                       # conservative: v7x per-TC VMEM
    limit = min((cap * 3) // 4, 96 * _MIB)    # 48 MiB on v7x, 96 MiB on v5e/v6e
    # Peak VMEM ~= 2x(in) + 2x(out) raw tiles + ~3 f32 temporaries (x, xc, y)
    # => up to ~10x the tile budget for bf16 inputs, so cap budget at limit/10.
    budget = max(2 * _MIB, min(8 * _MIB, limit // 10))
    return budget, limit


_VMEM_BUDGET_PER_BUF, _VMEM_LIMIT_BYTES = _vmem_config()


# --------------------------------------------------------------------------- #
# Kernels
# --------------------------------------------------------------------------- #
def _ln_last_kernel(x_ref, w_ref, b_ref, o_ref, *, eps, inv_c):
    # x_ref: (TM, C) tile, normalize over lanes (last axis). Used when C >= 128
    # (or C does not divide 128), so the lane axis is already dense enough.
    x = x_ref[...].astype(jnp.float32)
    mean = jnp.sum(x, axis=-1, keepdims=True) * inv_c
    xc = x - mean
    var = jnp.sum(xc * xc, axis=-1, keepdims=True) * inv_c        # biased (torch)
    inv = jax.lax.rsqrt(var + eps)
    o_ref[...] = (xc * inv * w_ref[...] + b_ref[...]).astype(o_ref.dtype)


def _ln_packed_kernel(x_ref, w_ref, b_ref, bd_ref, o_ref, *, eps):
    # Lane-dense path for small C: each (TM, 128) row holds `pack = 128 // C`
    # independent samples. bd_ref is the constant block-diagonal matrix
    # kron(I_pack, ones(C, C) / C): x @ bd yields each sample's mean broadcast
    # back over that sample's C lanes. The segmented reduction runs on the MXU
    # (otherwise idle here) and every load/store is a full-width 128-lane op.
    # Precision.HIGH is enough: bd entries are 1/C with C a power of two
    # (exact in bf16), and it halves MXU passes vs HIGHEST (v5e stays HBM-bound).
    x = x_ref[...].astype(jnp.float32)
    bd = bd_ref[...]
    mean = jnp.dot(x, bd, precision=jax.lax.Precision.HIGH,
                   preferred_element_type=jnp.float32)
    xc = x - mean
    var = jnp.dot(xc * xc, bd, precision=jax.lax.Precision.HIGH,
                  preferred_element_type=jnp.float32)
    inv = jax.lax.rsqrt(var + eps)
    o_ref[...] = (xc * inv * w_ref[...] + b_ref[...]).astype(o_ref.dtype)


def _ln_first_kernel(x_ref, w_ref, b_ref, o_ref, *, eps, inv_c):
    # channels_first native: x_ref is a (BN, C, T) slab of the (N, C, H*W) view.
    # Reduce over the channel (sublane) axis; spatial positions sit on lanes,
    # so stores are lane-dense and no HBM transpose is needed.
    x = x_ref[...].astype(jnp.float32)
    mean = jnp.sum(x, axis=1, keepdims=True) * inv_c
    xc = x - mean
    var = jnp.sum(xc * xc, axis=1, keepdims=True) * inv_c
    inv = jax.lax.rsqrt(var + eps)
    o_ref[...] = (xc * inv * w_ref[...] + b_ref[...]).astype(o_ref.dtype)


# --------------------------------------------------------------------------- #
# Tile sizing helpers
# --------------------------------------------------------------------------- #
def _sublane_multiple(itemsize):
    # 8 for f32, 16 for bf16, 32 for int8 (packed-layout sublane multiples).
    return max(8, 32 // max(int(itemsize), 1))


def _round_up(x, m):
    return ((x + m - 1) // m) * m


def _row_tile(rows, row_bytes, sub):
    """Row-tile as big as the VMEM budget allows, but always >= 2 grid steps
    (when the array is big enough) so both v7x TensorCores get work."""
    tm = _VMEM_BUDGET_PER_BUF // max(row_bytes, 1)
    tm = max(sub, (tm // sub) * sub)
    if rows <= tm:
        if rows >= _MIN_PARALLEL_BLOCKS * sub:
            tm = _round_up(pl.cdiv(rows, _MIN_PARALLEL_BLOCKS), sub)
        else:
            return rows          # single full block (block dim == array dim is legal)
    return min(tm, rows)


def _lane_tile(cols, col_bytes):
    t = _VMEM_BUDGET_PER_BUF // max(col_bytes, 1)
    t = max(_LANES, (t // _LANES) * _LANES)
    if cols <= t:
        return cols              # full last dim is always a legal block size
    return t


# --------------------------------------------------------------------------- #
# Wrappers
# --------------------------------------------------------------------------- #
def _layernorm_channels_last(x, w_row, b_row, bd, pack, eps):
    orig_shape = x.shape
    c = orig_shape[-1]
    x2d = x.reshape(-1, c)                      # free reshape (row-major)
    m = x2d.shape[0]
    itemsize = jnp.dtype(x.dtype).itemsize
    sub = _sublane_multiple(itemsize)

    pad = 0
    if pack > 1:
        pad = (-m) % pack
        if pad:
            # Keep the lane-dense packed path: pad at most pack-1 zero rows
            # (zeros -> var=0 -> rsqrt(eps), finite) and slice after.
            x2d = jnp.concatenate(
                [x2d, jnp.zeros((pad, c), dtype=x2d.dtype)], axis=0)
    c_eff = pack * c
    rows = (m + pad) // pack
    x2d = x2d.reshape(rows, c_eff)              # free reshape: pack samples/row

    tm = _row_tile(rows, c_eff * itemsize, sub)
    grid = (pl.cdiv(rows, tm),)

    args = [x2d, w_row, b_row]
    in_specs = [
        pl.BlockSpec((tm, c_eff), lambda i: (i, 0)),
        pl.BlockSpec((1, c_eff), lambda i: (0, 0)),   # constant block -> resident
        pl.BlockSpec((1, c_eff), lambda i: (0, 0)),
    ]
    if pack > 1:
        args.append(bd)
        in_specs.append(pl.BlockSpec((c_eff, c_eff), lambda i: (0, 0)))
        kernel = functools.partial(_ln_packed_kernel, eps=eps)
    else:
        kernel = functools.partial(_ln_last_kernel, eps=eps, inv_c=1.0 / c)

    out = pl.pallas_call(
        kernel,
        out_shape=jax.ShapeDtypeStruct((rows, c_eff), x.dtype),
        grid_spec=pltpu.PrefetchScalarGridSpec(
            num_scalar_prefetch=0,
            grid=grid,
            in_specs=in_specs,
            out_specs=pl.BlockSpec((tm, c_eff), lambda i: (i, 0)),
        ),
        compiler_params=pltpu.CompilerParams(
            dimension_semantics=("parallel",),
            vmem_limit_bytes=_VMEM_LIMIT_BYTES),
    )(*args)

    out = out.reshape(rows * pack, c)
    if pad:
        out = out[:m]
    return out.reshape(orig_shape)


def _layernorm_channels_first(x, w3d, b3d, eps):
    n, c = x.shape[0], x.shape[1]
    hw = 1
    for s in x.shape[2:]:
        hw *= int(s)
    x3d = x.reshape(n, c, hw)                   # free reshape, no transpose
    itemsize = jnp.dtype(x.dtype).itemsize

    sample_bytes = c * hw * itemsize
    if sample_bytes >= _VMEM_BUDGET_PER_BUF:
        bn = 1
        t_hw = _lane_tile(hw, c * itemsize)     # tile the spatial (lane) axis
    else:
        # Batch several samples per grid step -> MiB-scale DMAs for the
        # small-spatial HorNet stages (e.g. N x 512 x 7 x 7).
        bn = max(1, min(n, _VMEM_BUDGET_PER_BUF // max(sample_bytes, 1)))
        t_hw = hw

    # Keep >= 2 grid steps for megacore when the batch allows it.
    if bn >= n and t_hw >= hw and n >= _MIN_PARALLEL_BLOCKS:
        bn = pl.cdiv(n, _MIN_PARALLEL_BLOCKS)

    grid = (pl.cdiv(n, bn), pl.cdiv(hw, t_hw))

    out = pl.pallas_call(
        functools.partial(_ln_first_kernel, eps=eps, inv_c=1.0 / c),
        out_shape=jax.ShapeDtypeStruct((n, c, hw), x.dtype),
        grid_spec=pltpu.PrefetchScalarGridSpec(
            num_scalar_prefetch=0,
            grid=grid,
            in_specs=[
                pl.BlockSpec((bn, c, t_hw), lambda i, j: (i, 0, j)),
                pl.BlockSpec((1, c, 1), lambda i, j: (0, 0, 0)),
                pl.BlockSpec((1, c, 1), lambda i, j: (0, 0, 0)),
            ],
            out_specs=pl.BlockSpec((bn, c, t_hw), lambda i, j: (i, 0, j)),
        ),
        compiler_params=pltpu.CompilerParams(
            dimension_semantics=("parallel", "parallel"),
            vmem_limit_bytes=_VMEM_LIMIT_BYTES),
    )(x3d, w3d, b3d)

    return out.reshape(x.shape)


class LayerNorm:
    """JAX/Pallas equivalent of the PyTorch HorNet LayerNorm."""

    def __init__(self, normalized_shape, eps=1e-06, data_format="channels_last"):
        if data_format not in ("channels_last", "channels_first"):
            raise NotImplementedError
        self.c = int(normalized_shape)
        self.eps = float(eps)
        self.data_format = data_format
        # Deterministic parameter init (matches nn.Parameter(torch.ones/zeros)).
        self.weight = jnp.ones((self.c,), dtype=jnp.float32)
        self.bias = jnp.zeros((self.c,), dtype=jnp.float32)
        self._build_constants()

    def set_params(self, weight, bias):
        """Update parameters and rebuild the hoisted per-call constants."""
        self.weight = jnp.asarray(weight, dtype=jnp.float32).reshape(self.c)
        self.bias = jnp.asarray(bias, dtype=jnp.float32).reshape(self.c)
        self._build_constants()

    def _build_constants(self):
        c = self.c
        w = self.weight.astype(jnp.float32)
        b = self.bias.astype(jnp.float32)
        if self.data_format == "channels_first":
            self._w3d = w.reshape(1, c, 1)
            self._b3d = b.reshape(1, c, 1)
        else:
            pack = 1
            if c < _LANES and _LANES % c == 0:
                pack = _LANES // c
            self._pack = pack
            self._w_row = jnp.tile(w, pack).reshape(1, pack * c)
            self._b_row = jnp.tile(b, pack).reshape(1, pack * c)
            self._bd = None
            if pack > 1:
                self._bd = jnp.kron(
                    jnp.eye(pack, dtype=jnp.float32),
                    jnp.full((c, c), 1.0 / c, dtype=jnp.float32))

    def __call__(self, x):
        if self.data_format == "channels_last":
            assert x.shape[-1] == self.c
            return _layernorm_channels_last(
                x, self._w_row, self._b_row, self._bd, self._pack, self.eps)
        else:
            assert x.shape[1] == self.c
            return _layernorm_channels_first(x, self._w3d, self._b3d, self.eps)


# --------------------------------------------------------------------------- #
# Reference + test
# --------------------------------------------------------------------------- #
def _reference(x, weight, bias, eps, data_format):
    if data_format == "channels_last":
        mean = jnp.mean(x, axis=-1, keepdims=True)
        var = jnp.mean((x - mean) ** 2, axis=-1, keepdims=True)
        return (x - mean) / jnp.sqrt(var + eps) * weight + bias
    else:
        u = jnp.mean(x, axis=1, keepdims=True)
        s = jnp.mean((x - u) ** 2, axis=1, keepdims=True)
        xn = (x - u) / jnp.sqrt(s + eps)
        return weight[None, :, None, None] * xn + bias[None, :, None, None]


if __name__ == "__main__":
    key = jax.random.PRNGKey(0)
    k1, k2, k3, k4, k5, k6 = jax.random.split(key, 6)
    eps = 1e-6

    # channels_first: (N, C, H, W) = (2, 32, 8, 8) -> native channels_first kernel.
    C = 32
    x_cf = jax.random.normal(k1, (2, C, 8, 8), dtype=jnp.float32)
    ln_cf = LayerNorm(C, eps=eps, data_format="channels_first")
    y_cf = ln_cf(x_cf)
    jax.block_until_ready(y_cf)

    # channels_last: (N, H, W, C) = (2, 8, 8, 32) -> lane-packed MXU kernel.
    x_cl = jax.random.normal(k2, (2, 8, 8, C), dtype=jnp.float32)
    ln_cl = LayerNorm(C, eps=eps, data_format="channels_last")
    y_cl = ln_cl(x_cl)
    jax.block_until_ready(y_cl)

    # channels_last with wide C and non-trivial affine params: (2, 4, 4, 192).
    C2 = 192
    x_cl2 = jax.random.normal(k3, (2, 4, 4, C2), dtype=jnp.float32)
    ln_cl2 = LayerNorm(C2, eps=eps, data_format="channels_last")
    ln_cl2.set_params(jax.random.normal(k4, (C2,)) * 0.5 + 1.0,
                      jax.random.normal(k5, (C2,)) * 0.1)
    y_cl2 = ln_cl2(x_cl2)
    jax.block_until_ready(y_cl2)

    # channels_last where rows are NOT a multiple of the lane pack:
    # (1, 3, 7, 32) -> 21 rows, pack=4 -> pad-to-24 path.
    x_cl3 = jax.random.normal(k6, (1, 3, 7, C), dtype=jnp.float32)
    y_cl3 = ln_cl(x_cl3)
    jax.block_until_ready(y_cl3)

    ref_cf = _reference(x_cf, ln_cf.weight, ln_cf.bias, eps, "channels_first")
    ref_cl = _reference(x_cl, ln_cl.weight, ln_cl.bias, eps, "channels_last")
    ref_cl2 = _reference(x_cl2, ln_cl2.weight, ln_cl2.bias, eps, "channels_last")
    ref_cl3 = _reference(x_cl3, ln_cl.weight, ln_cl.bias, eps, "channels_last")
    assert jnp.allclose(y_cf, ref_cf, atol=1e-5, rtol=1e-5)
    assert jnp.allclose(y_cl, ref_cl, atol=1e-5, rtol=1e-5)
    assert jnp.allclose(y_cl2, ref_cl2, atol=1e-5, rtol=1e-5)
    assert jnp.allclose(y_cl3, ref_cl3, atol=1e-5, rtol=1e-5)

    print("KERNEL_OK")
</pallas_src>

<mosaic_0001>
module attributes {stable_mosaic.version = 11 : i64} {
  func.func @_ln_first_kernel(%arg0: i32, %arg1: i32, %arg2: memref<1x32x64xf32, #tpu.memory_space<vmem>>, %arg3: memref<1x32x1xf32, #tpu.memory_space<vmem>>, %arg4: memref<1x32x1xf32, #tpu.memory_space<vmem>>, %arg5: memref<1x32x64xf32, #tpu.memory_space<vmem>>) attributes {dimension_semantics = [#tpu.dimension_semantics<parallel>, #tpu.dimension_semantics<parallel>], iteration_bounds = array<i64: 2, 1>, scalar_prefetch = 0 : i64, scratch_operands = 0 : i64, tpu.core_type = #tpu.core_type<tc>, window_params = [{transform_indices = @transform_0, window_bounds = array<i64: 1, 32, 64>}, {pipeline_mode = #tpu.pipeline_mode<synchronous>, transform_indices = @transform_1, window_bounds = array<i64: 1, 32, 1>}, {pipeline_mode = #tpu.pipeline_mode<synchronous>, transform_indices = @transform_2, window_bounds = array<i64: 1, 32, 1>}, {transform_indices = @transform_3, window_bounds = array<i64: 1, 32, 64>}]} {
    %c0 = arith.constant 0 : index
    %c0_0 = arith.constant 0 : index
    %c0_1 = arith.constant 0 : index
    %0 = vector.load %arg2[%c0, %c0_0, %c0_1] : memref<1x32x64xf32, #tpu.memory_space<vmem>>, vector<1x32x64xf32>
    %cst = arith.constant dense<0.000000e+00> : vector<1x64xf32>
    %1 = vector.multi_reduction <add>, %0, %cst [1] : vector<1x32x64xf32> to vector<1x64xf32>
    %2 = vector.shape_cast %1 : vector<1x64xf32> to vector<1x1x64xf32>
    %cst_2 = arith.constant 3.125000e-02 : f32
    %3 = vector.broadcast %cst_2 : f32 to vector<1x1x64xf32>
    %4 = arith.mulf %2, %3 : vector<1x1x64xf32>
    %5 = vector.broadcast %4 : vector<1x1x64xf32> to vector<1x32x64xf32>
    %6 = arith.subf %0, %5 : vector<1x32x64xf32>
    %7 = arith.mulf %6, %6 : vector<1x32x64xf32>
    %cst_3 = arith.constant dense<0.000000e+00> : vector<1x64xf32>
    %8 = vector.multi_reduction <add>, %7, %cst_3 [1] : vector<1x32x64xf32> to vector<1x64xf32>
    %9 = vector.shape_cast %8 : vector<1x64xf32> to vector<1x1x64xf32>
    %cst_4 = arith.constant 3.125000e-02 : f32
    %10 = vector.broadcast %cst_4 : f32 to vector<1x1x64xf32>
    %11 = arith.mulf %9, %10 : vector<1x1x64xf32>
    %cst_5 = arith.constant 9.99999997E-7 : f32
    %12 = vector.broadcast %cst_5 : f32 to vector<1x1x64xf32>
    %13 = arith.addf %11, %12 : vector<1x1x64xf32>
    %14 = math.rsqrt %13 : vector<1x1x64xf32>
    %15 = vector.broadcast %14 : vector<1x1x64xf32> to vector<1x32x64xf32>
    %16 = arith.mulf %6, %15 : vector<1x32x64xf32>
    %c0_6 = arith.constant 0 : index
    %c0_7 = arith.constant 0 : index
    %c0_8 = arith.constant 0 : index
    %17 = vector.load %arg3[%c0_6, %c0_7, %c0_8] : memref<1x32x1xf32, #tpu.memory_space<vmem>>, vector<1x32x1xf32>
    %18 = vector.broadcast %17 : vector<1x32x1xf32> to vector<1x32x64xf32>
    %19 = arith.mulf %16, %18 : vector<1x32x64xf32>
    %c0_9 = arith.constant 0 : index
    %c0_10 = arith.constant 0 : index
    %c0_11 = arith.constant 0 : index
    %20 = vector.load %arg4[%c0_9, %c0_10, %c0_11] : memref<1x32x1xf32, #tpu.memory_space<vmem>>, vector<1x32x1xf32>
    %21 = vector.broadcast %20 : vector<1x32x1xf32> to vector<1x32x64xf32>
    %22 = arith.addf %19, %21 : vector<1x32x64xf32>
    %c0_12 = arith.constant 0 : index
    %c0_13 = arith.constant 0 : index
    %c0_14 = arith.constant 0 : index
    %23 = vector.load %arg5[%c0_12, %c0_13, %c0_14] : memref<1x32x64xf32, #tpu.memory_space<vmem>>, vector<1x32x64xf32>
    tpu.vector_store %arg5[%c0_12, %c0_13, %c0_14], %22 {strides = array<i32>} : memref<1x32x64xf32, #tpu.memory_space<vmem>>, vector<1x32x64xf32>,
    return
  }
  func.func @transform_0(%arg0: i32, %arg1: i32) -> (i32, i32, i32) {
    %c0_i32 = arith.constant 0 : i32
    %c0_i32_0 = arith.constant 0 : i32
    return %arg0, %c0_i32, %arg1 : i32, i32, i32
  }
  func.func @transform_1(%arg0: i32, %arg1: i32) -> (i32, i32, i32) {
    %c0_i32 = arith.constant 0 : i32
    %c0_i32_0 = arith.constant 0 : i32
    %c0_i32_1 = arith.constant 0 : i32
    %c0_i32_2 = arith.constant 0 : i32
    return %c0_i32, %c0_i32_0, %c0_i32_1 : i32, i32, i32
  }
  func.func @transform_2(%arg0: i32, %arg1: i32) -> (i32, i32, i32) {
    %c0_i32 = arith.constant 0 : i32
    %c0_i32_0 = arith.constant 0 : i32
    %c0_i32_1 = arith.constant 0 : i32
    %c0_i32_2 = arith.constant 0 : i32
    return %c0_i32, %c0_i32_0, %c0_i32_1 : i32, i32, i32
  }
  func.func @transform_3(%arg0: i32, %arg1: i32) -> (i32, i32, i32) {
    %c0_i32 = arith.constant 0 : i32
    %c0_i32_0 = arith.constant 0 : i32
    return %arg0, %c0_i32, %arg1 : i32, i32, i32
  }
}

</mosaic_0001>

<bundles_post_ra>
// kernel: tpu_custom_call.1
= control target key start
LH: loop header
LB: loop body
LE: loop exit
PB: predicated region body
PF: predicated region fallthrough
CT: control target
= control target key end

     0   :  { %8 = vsyncpa [#allocation3], 0  ;;  %s723_s0 = inlined_call_operand.vmem [shape: f32[2,32,64], index: 0, kind: input, shape index: {}]   ;;  %s724_s1 = inlined_call_operand.vmem [shape: f32[1,32,1], index: 1, kind: input, shape index: {}]   ;;  %s725_s2 = inlined_call_operand.vmem [shape: f32[1,32,1], index: 2, kind: input, shape index: {}]   ;;  %s726_s3 = inlined_call_operand.hbm [shape: f32[2,32,64], index: 3, kind: output, shape index: {}]  }
   0x1   :  { %10 = vsyncpa [#allocation3 + $0x1], 0  ;;  %s573_s12 = smov 0   ;;  %s575_s13 = smov 0  }
   0x2   :  { %s577_s14 = smov 0   ;;  %s579_s15 = smov 0  }
   0x3   :  { %s581_s16 = smov 0   ;;  %s583_s17 = smov 0  }
   0x4 LB: > { %s394_s18 = sadd.s32 4294967295, %s547_s17   ;;  %s395_s19 = sadd.s32 4294967294, %s547_s17   ;;  %s547_s17 = sphi %s583_s17, %s16_s17   ;;  %s543_s16 = sphi %s581_s16, %s733_s16   ;;  %s539_s15 = sphi %s579_s15, %s732_s15   ;;  %s535_s14 = sphi %s577_s14, %s731_s14   ;;  %s531_s13 = sphi %s575_s13, %s730_s13   ;;  %s527_s12 = sphi %s573_s12, %s729_s12  }
   0x5   : > { %s28_s20 = sadd.s32 1, %s543_s16  ;;  %s107_s21 = sadd.s32 1, %s535_s14 }
   0x6   : > { %p30_p0 = scmp.ge.s32.totalorder %s28_s20, 2  ;;  %p117_p1 = scmp.ne.s32.totalorder %s535_s14, %s531_s13 }
   0x7   : > { %p118_p2 = scmp.eq.s32.totalorder %s394_s18, 1  ;;  %p123_p3 = scmp.ne.s32.totalorder %s531_s13, %s527_s12 }
   0x8   : > { %s735_s20 = smov (%p30_p0, %s28_s20), 0  ;;  %p124_p5 = scmp.eq.s32.totalorder %s395_s19, 1 }
   0x9   : > { %p613_p4 = por %p118_p2, %p117_p1  ;;  %s102_s23 = ssub.s32 %s543_s16, %s735_s20 }
   0xa   : > { %p398_p6 = scmp.ge.s32.totalorder %s547_s17, 1  ;;  %p105_p7 = scmp.eq.s32.totalorder %s102_s23, 0 }
   0xb   : > { %p620_p8 = por %p124_p5, %p123_p3  ;;  %p159_p9 = scmp.lt.s32.totalorder %s547_s17, 3 }
   0xc   : > { %s626_s25 = scalar_select %p105_p7, %s535_s14, %s107_s21  }
   0xd   : > { %p160_p10 = pnand %p398_p6, %p159_p9 }
   0xe   : > { %p186_p11 = scmp.lt.s32.totalorder (!%p160_p10), %s539_s15, 1  ;;  %s408_s7 = sshll.u32 (!%p160_p10), %s539_s15, 9 }
   0xf   : > { %163 = sbr.rel (%p160_p10) target bundleno = 174 (0xae), region = 32  ;;  %s674_s10 = scalar_lea.hbm (!%p160_p10), %s726_s3, %s408_s7 }
  0x10   : > { %s550_s18 = smov (!%p160_p10), [#allocation2]  }
  0x11   : > { %s475_s19 = sshll.u32 (!%p160_p10), %s550_s18, 4  ;;  %s476_s19 = int_to_ptr.vmem [resolvable:$false] %s475_s19 }
  0x12   : > { %s477_s21 = scalar_lea.vmem (!%p160_p10), %s476_s19, 1024 }
  0x14   : > { %v243_v0 = vld [vmem:[%s724_s1 + $0x10] sm:$0xff]  ;;  %v241_v1 = vld [vmem:[%s724_s1] sm:$0xff]  ;;  %v549_v2 = vmov 0   ;;  %s187_s30 = scalar_select %p186_p11, %s539_s15, 1  ;;  %v244_v3 = vld [vmem:[%s724_s1 + $0x18] sm:$0xff]  ;;  %vm198_vm0 = vcmask 523264  }
  0x15   : > { %468 = vset.pattern.permute.xlu1 %v549_v2  ;;  %467 = vset.pattern.permute.xlu0 %v549_v2  ;;  %v242_v4 = vld [vmem:[%s724_s1 + $0x8] sm:$0xff]  ;;  %v269_v6 = vld [vmem:[%s725_s2] sm:$0xff]  ;;  %v272_v7 = vld [vmem:[%s725_s2 + $0x18] sm:$0xff] }
  0x16   : > { %257 = vperm.xlu1 %468, %v243_v0   ;;  %247 = vperm.xlu0 %467, %v241_v1   ;;  %s407_s8 = sshll.u32 %s187_s30, 5  ;;  %v270_v5 = vld [vmem:[%s725_s2 + $0x8] sm:$0xff]  ;;  %v271_v8 = vld [vmem:[%s725_s2 + $0x10] sm:$0xff]  ;;  %s183_s30 = sand.u32 1, %s531_s13  }
  0x17   : > { %s193_s23 = scalar_lea.vmem %s723_s0, %s407_s8  ;;  %s399_s4 = sshll.u32 %s183_s30, 5 }
  0x18   : > { %v194_v9 = vld [vmem:[%s193_s23] sm:$0xff]  ;;  %v195_v10 = vld [vmem:[%s193_s23 + $0x8] sm:$0xff]  ;;  %v196_v13 = vld [vmem:[%s193_s23 + $0x10] sm:$0xff]  ;;  %s185_s5 = scalar_lea.vmem [#allocation2], %s399_s4  ;;  %s678_s15 = scalar_lea.sflag [#allocation3], %s183_s30 }
  0x19   : > { %v199_v11 = vsel %vm198_vm0, %v194_v9, 0.0  ;;  %v200_v12 = vsel %vm198_vm0, %v195_v10, 0.0  ;;  %v202_v15 = vsel %vm198_vm0, %v196_v13, 0.0  ;;  %v197_v16 = vld [vmem:[%s193_s23 + $0x18] sm:$0xff]  ;;  %s316_s6 = sshll.u32 %s185_s5, 4  ;;  %s669_s6 = int_to_ptr.vmem [resolvable:$true] %s316_s6 }
  0x1a   : > { %262 = vperm.xlu1 %468, %v244_v3   ;;  %252 = vperm.xlu0 %467, %v242_v4   ;;  %v201_v14 = vadd.f32 %v200_v12, %v199_v11  ;;  %v204_v18 = vsel %vm198_vm0, %v197_v16, 0.0  ;;  %s471_s11 = scalar_lea.vmem %s669_s6, 512  ;;  %p478_p1 = scmp.lt.s32.totalorder %s669_s6, %s476_s19 }
  0x1b   : > { %p472_p12 = scmp.ne.s32.totalorder %s669_s6, %s471_s11  ;;  %p479_p2 = scmp.lt.s32.totalorder %s477_s21, %s471_s11 }
  0x1c   : > { %v203_v17 = vadd.f32 %v202_v15, %v201_v14 }
  0x1d   : > { %p473_p13 = pnand %p472_p12, %p613_p4  ;;  %p480_p3 = por %p479_p2, %p478_p1 }
  0x1e   : > { %280 = vperm.xlu1 %468, %v270_v5   ;;  %275 = vperm.xlu0 %467, %v269_v6   ;;  %v205_v19 = vadd.f32 %v204_v18, %v203_v17 }
  0x1f   : > { %p474_p0 = pneg %p473_p13 }
  0x20   : > { %v206_v20 = vrot.slane %v205_v19, 4 }
  0x21   : > { %p481_p5 = pnand %p480_p3, %p474_p0 }
  0x22   : > { %290 = vperm.xlu1 %468, %v272_v7   ;;  %285 = vperm.xlu0 %467, %v271_v8   ;;  %v207_v21 = vadd.f32 %v206_v20, %v205_v19 }
  0x24   : > { %v208_v22 = vrot.slane %v207_v21, 2 }
  0x26   : > { %v209_v23 = vadd.f32 %v208_v22, %v207_v21 }
  0x28   : > { %v210_v24 = vrot.slane %v209_v23, 1 }
  0x2a   : > { %v211_v25 = vadd.f32 %v210_v24, %v209_v23 }
  0x2c   : > { %v212_v26 = vmul.f32 0.03125, %v211_v25 }
  0x2e   : > { %v213_v27 = vsub.f32 %v194_v9, %v212_v26  ;;  %v214_v28 = vsub.f32 %v195_v10, %v212_v26  ;;  %v215_v29 = vsub.f32 %v196_v13, %v212_v26  ;;  %v216_v32 = vsub.f32 %v197_v16, %v212_v26 }
  0x30   : > { %v217_v30 = vmul.f32 %v213_v27, %v213_v27  ;;  %v218_v31 = vmul.f32 %v214_v28, %v214_v28  ;;  %v219_v33 = vmul.f32 %v215_v29, %v215_v29  ;;  %v220_v37 = vmul.f32 %v216_v32, %v216_v32 }
  0x32   : > { %v221_v34 = vsel %vm198_vm0, %v217_v30, 0.0  ;;  %v222_v35 = vsel %vm198_vm0, %v218_v31, 0.0  ;;  %v224_v38 = vsel %vm198_vm0, %v219_v33, 0.0  ;;  %v226_v40 = vsel %vm198_vm0, %v220_v37, 0.0 }
  0x33   : > { %v223_v36 = vadd.f32 %v222_v35, %v221_v34 }
  0x35   : > { %v225_v39 = vadd.f32 %v224_v38, %v223_v36 }
  0x37   : > { %v227_v41 = vadd.f32 %v226_v40, %v225_v39 }
  0x39   : > { %v228_v42 = vrot.slane %v227_v41, 4 }
  0x3b   : > { %v229_v43 = vadd.f32 %v228_v42, %v227_v41 }
  0x3d   : > { %v230_v44 = vrot.slane %v229_v43, 2 }
  0x3f   : > { %v231_v45 = vadd.f32 %v230_v44, %v229_v43 }
  0x41   : > { %v232_v46 = vrot.slane %v231_v45, 1 }
  0x43   : > { %v233_v47 = vadd.f32 %v232_v46, %v231_v45 }
  0x45   : > { %v234_v48 = vmul.f32 0.03125, %v233_v47 }
  0x47   : > { %v235_v49 = vadd.f32 1e-06, %v234_v48 }
  0x49   : > { %469 = vrsqrt.f32 %v235_v49 }
  0x56   : > { %v470_v50 = vpop.eup %469 }
  0x57   : > { %v237_v53 = vmul.f32 %v470_v50, %v213_v27  ;;  %v238_v54 = vmul.f32 %v470_v50, %v214_v28  ;;  %v239_v57 = vmul.f32 %v470_v50, %v215_v29  ;;  %v240_v59 = vmul.f32 %v470_v50, %v216_v32 }
  0x91   : > { %v258_v51 = vpop.permute.xlu1 %257  ;;  %v248_v52 = vpop.permute.xlu0 %247 }
  0x92   : > { %v265_v58 = vmul.f32 %v248_v52, %v237_v53  ;;  %v267_v1 = vmul.f32 %v258_v51, %v239_v57 }
  0x95   : > { %v263_v55 = vpop.permute.xlu1 %262  ;;  %v253_v56 = vpop.permute.xlu0 %252 }
  0x96   : > { %v266_v60 = vmul.f32 %v253_v56, %v238_v54  ;;  %v268_v2 = vmul.f32 %v263_v55, %v240_v59 }
  0x99   : > { %v281_v61 = vpop.permute.xlu1 %280  ;;  %v276_v62 = vpop.permute.xlu0 %275 }
  0x9a   : > { %v294_v63 = vadd.f32 %v281_v61, %v266_v60  ;;  %v293_v0 = vadd.f32 %v276_v62, %v265_v58 }
  0x9c   : > { %298 = vst.msk [vmem:[%s185_s5 + $0x8] sm:$0xff] %vm198_vm0, %v294_v63  ;;  %297 = vst.msk [vmem:[%s185_s5] sm:$0xff] %vm198_vm0, %v293_v0 }
  0x9d   : > { %v291_v3 = vpop.permute.xlu1 %290  ;;  %v286_v4 = vpop.permute.xlu0 %285 }
  0x9e   : > { %v296_v5 = vadd.f32 %v291_v3, %v268_v2  ;;  %v295_v6 = vadd.f32 %v286_v4, %v267_v1 }
  0xa0   : > { %300 = vst.msk [vmem:[%s185_s5 + $0x18] sm:$0xff] %vm198_vm0, %v296_v5  ;;  %299 = vst.msk [vmem:[%s185_s5 + $0x10] sm:$0xff] %vm198_vm0, %v295_v6 }
  0xa1   : > { %484 = shalt.err (!%p481_p5)
}
  0xa2   : > { %s485_s23 = scalar_lea.hbm %s674_s10, 512  ;;  %s489_s28 = scalar_lea.hbm %s726_s3, 1024 }
  0xa3   : > { %p486_p6 = scmp.ne.s32.totalorder %s674_s10, %s485_s23  ;;  %p490_p10 = scmp.lt.s32.totalorder %s674_s10, %s726_s3 }
  0xa4   : > { %p491_p11 = scmp.lt.s32.totalorder %s489_s28, %s485_s23 }
  0xa5   : > { %p487_p7 = pnand %p486_p6, %p613_p4 }
  0xa6   : > { %p492_p12 = por %p491_p11, %p490_p10 }
  0xa7   : > { %p488_p9 = pneg %p487_p7 }
  0xa9   : > { %p493_p13 = pnand %p492_p12, %p488_p9 }
  0xab   : > { %496 = shalt.err (!%p493_p13)
}
  0xac   : > { %s551_s4 = smov 128   ;;  %s552_s5 = smov 8  }
  0xad   : > { %409 = dma.vmem_to_hbm [thread:$0]  (%p613_p4), %s669_s6, 512, %s674_s10, %s678_s15, %s551_s4, %s551_s4, %s552_s5  }
  0xae PF: > { %p415_p0 = scmp.ge.s32.totalorder %s547_s17, 2  ;;  %s331_s7 = sand.u32 1, %s527_s12  }
  0xaf   : > { %s332_s8 = scalar_lea.sflag [#allocation3], %s331_s7 }
  0xb0   : > { %p412_p1 = pnand %p415_p0, %p620_p8 }
  0xb2   : > { %p413_p2 = pneg %p412_p1 }
  0xb4   : > { %522 = dma.done.wait (%p413_p2), %s332_s8, 512  }
  0xb5   : > { %524 = vsyncadd (%p413_p2), %s332_s8, 4294966784  ;;  %s16_s17 = sadd.s32 1, %s547_s17   ;;  %s729_s12 = smov %s531_s13 }
  0xb6   : > { %p13_p3 = scmp.ge.s32.totalorder %s16_s17, 4   ;;  %s730_s13 = smov %s535_s14 }
  0xb7   : > { %s731_s14 = smov %s626_s25  ;;  %s732_s15 = smov %s543_s16 }
  0xb8   : > { %s733_s16 = smov %s735_s20  ;;  %15 = sbr.rel (!%p13_p3) target bundleno = 4 (0x4), region = 67 }
  0xbd   :  { %337 = vsyncpa [#allocation3], 1 }
  0xbe   :  { %339 = vsyncpa [#allocation3 + $0x1], 1 }

</bundles_post_ra>
